<compile_context>
chip_gen: v7x
topology: tpu7x:2x2x1
jax: 0.10.0
libtpu: 0.0.40
codegen_flags: <defaults>
</compile_context>

<pallas_src>
import functools

import jax
import jax.numpy as jnp
from jax.experimental import pallas as pl
from jax.experimental.pallas import tpu as pltpu


NHIDDEN = 128
_BN_EPS = 1e-5


def _round_up(n, m):
    return ((n + m - 1) // m) * m


def _vmem_capacity_bytes():
    """Physical VMEM per TensorCore; conservative 64 MiB fallback (v7x-safe)."""
    try:
        info = pltpu.get_tpu_info()
        cap = getattr(info, "vmem_capacity_bytes", None)
        if cap:
            return int(cap)
    except Exception:
        pass
    return 64 * 1024 * 1024


def fakedetfc_kernel(x_ref, w1_ref, b1_ref, w2_ref, b2_ref, o_ref, *, odim):
    cdt = w1_ref.dtype                          # compute dtype (f32 or bf16)

    # Linear(idim -> nhidden) with BN already folded into w1/b1 (MXU, f32 acc).
    # The in-kernel cast to bf16 is VPU filler (free); do NOT pre-cast x in
    # the wrapper (extra HBM pass).
    x = x_ref[...].astype(cdt)                  # (TB, idim)
    h = jnp.dot(x, w1_ref[...], preferred_element_type=jnp.float32)
    h = h + b1_ref[...]                         # (TB, 128), f32

    # Dropout = identity (eval mode).

    # Linear(nhidden -> odim_pad) on the MXU.  Padded output columns carry a
    # -1e30 bias (f32!) so they contribute exp()=0 to the log-sum-exp.
    logits = jnp.dot(h.astype(cdt), w2_ref[...],
                     preferred_element_type=jnp.float32)
    logits = logits + b2_ref[...]               # (TB, odim_pad), f32

    # LogSoftmax over the feature axis (numerically stable, single final pass).
    m = jnp.max(logits, axis=-1, keepdims=True)
    lse = m + jnp.log(jnp.sum(jnp.exp(logits - m), axis=-1, keepdims=True))
    # Store only the real columns (o_ref is (TB, odim)); padded cols never hit HBM.
    o_ref[...] = (logits[:, :odim] - lse).astype(o_ref.dtype)


def prepare_params(params, *, compute_dtype=jnp.float32):
    """Fold eval-mode BatchNorm into the first Linear and pad the second
    Linear to a lane-dense width.  Call ONCE per parameter set (hoisted out of
    the per-forward wrapper to avoid a redundant HBM pass over the weights)."""
    w1, b1 = params["w1"], params["b1"]
    gamma, beta = params["gamma"], params["beta"]
    run_mean, run_var = params["run_mean"], params["run_var"]
    w2, b2 = params["w2"], params["b2"]

    idim = w1.shape[0]
    odim = w2.shape[1]
    odim_pad = _round_up(odim, 128)

    scale = gamma * jax.lax.rsqrt(run_var + _BN_EPS)          # (128,)
    shift = beta - run_mean * scale                           # (128,)
    w1f = (w1 * scale[None, :]).astype(compute_dtype)         # (idim, 128)
    b1f = (b1 * scale + shift).reshape(1, -1).astype(jnp.float32)

    # Padded bias = -1e30 (f32) -> exp() underflows to exactly 0 in the LSE.
    w2p = jnp.zeros((NHIDDEN, odim_pad), compute_dtype)
    w2p = w2p.at[:, :odim].set(w2.astype(compute_dtype))
    b2p = jnp.full((1, odim_pad), -1e30, jnp.float32)
    b2p = b2p.at[0, :odim].set(b2.astype(jnp.float32))

    return {"w1f": w1f, "b1f": b1f, "w2p": w2p, "b2p": b2p,
            "idim": idim, "odim": odim, "odim_pad": odim_pad}


def fakedetfc_forward(x, prepared, *, block_b=2048):
    """x: (B, idim) float32/bfloat16. Returns (B, odim) log-probs (float32)."""
    w1f, b1f = prepared["w1f"], prepared["b1f"]
    w2p, b2p = prepared["w2p"], prepared["b2p"]
    idim, odim, odim_pad = prepared["idim"], prepared["odim"], prepared["odim_pad"]

    B = x.shape[0]
    assert x.shape[1] == idim

    bx = jnp.dtype(x.dtype).itemsize
    bw = jnp.dtype(w1f.dtype).itemsize

    # --- VMEM budget ------------------------------------------------------
    vmem_budget = int(0.8 * _vmem_capacity_bytes())   # headroom for scratch

    def est_vmem(tb):
        return (2 * tb * idim * bx                    # x blocks (double-buffered)
                + 2 * tb * odim * 4                   # out blocks (double-buffered)
                + idim * NHIDDEN * bw + NHIDDEN * 4   # w1', b1' (resident)
                + NHIDDEN * odim_pad * bw + odim_pad * 4  # w2, b2 (resident)
                + 2 * tb * odim_pad * 4               # logits / exp temporaries
                + tb * NHIDDEN * 4)                   # hidden intermediate

    # --- batch tiling -------------------------------------------------------
    # Guarantee >= 2 "parallel" grid steps when B allows, so both v7x TCs get
    # work; keep TB a multiple of 8 (or full extent for tiny B).
    block_b = _round_up(block_b, 8)
    if B >= 16:
        TB = min(block_b, _round_up(pl.cdiv(B, 2), 8))
        while TB > 8 and est_vmem(TB) > vmem_budget:
            new_tb = max(8, _round_up(TB // 2, 8))
            if new_tb == TB:
                break
            TB = new_tb
    else:
        TB = B                                        # single full-extent block
    grid = (pl.cdiv(B, TB),)

    est = est_vmem(TB)
    vmem_bytes = int(min(vmem_budget, max(32 * 1024 * 1024, 2 * est)))

    cost = pl.CostEstimate(
        flops=int(2 * B * idim * NHIDDEN + 2 * B * NHIDDEN * odim_pad
                  + 6 * B * odim_pad),
        transcendentals=int(B * odim_pad + B),
        bytes_accessed=int(B * idim * bx + B * odim * 4
                           + idim * NHIDDEN * bw + NHIDDEN * 4
                           + NHIDDEN * odim_pad * bw + odim_pad * 4),
    )

    kernel = functools.partial(fakedetfc_kernel, odim=odim)

    def _call(single_buffer_weights):
        # Resident operands (constant index_map) don't need double-buffering.
        wkw = ({"pipeline_mode": pl.Buffered(1)}
               if single_buffer_weights else {})
        in_specs = [
            pl.BlockSpec((TB, idim), lambda i: (i, 0)),                 # x block
            pl.BlockSpec((idim, NHIDDEN), lambda i: (0, 0), **wkw),     # w1' resident
            pl.BlockSpec((1, NHIDDEN), lambda i: (0, 0), **wkw),        # b1' resident
            pl.BlockSpec((NHIDDEN, odim_pad), lambda i: (0, 0), **wkw), # w2  resident
            pl.BlockSpec((1, odim_pad), lambda i: (0, 0), **wkw),       # b2  resident
        ]
        return pl.pallas_call(
            kernel,
            out_shape=jax.ShapeDtypeStruct((B, odim), jnp.float32),
            grid=grid,
            in_specs=in_specs,
            out_specs=pl.BlockSpec((TB, odim), lambda i: (i, 0)),
            compiler_params=pltpu.CompilerParams(
                dimension_semantics=("parallel",),
                vmem_limit_bytes=vmem_bytes),
            cost_estimate=cost,
        )(x, w1f, b1f, w2p, b2p)

    try:
        return _call(True)
    except Exception:
        # Fallback for jax versions where pipeline_mode=pl.Buffered(1) is not
        # supported on the auto-pipelined pallas_call path.
        return _call(False)


def init_params(key, idim, odim):
    """Deterministic parameter init matching the module's shapes."""
    k1, k2, k3, k4 = jax.random.split(key, 4)
    w1 = jax.random.normal(k1, (idim, NHIDDEN), jnp.float32) * (1.0 / jnp.sqrt(idim))
    b1 = jax.random.normal(k2, (NHIDDEN,), jnp.float32) * 0.01
    w2 = jax.random.normal(k3, (NHIDDEN, odim), jnp.float32) * (1.0 / jnp.sqrt(NHIDDEN))
    b2 = jax.random.normal(k4, (odim,), jnp.float32) * 0.01
    return {
        "w1": w1, "b1": b1,
        "gamma": jnp.ones((NHIDDEN,), jnp.float32),
        "beta": jnp.zeros((NHIDDEN,), jnp.float32),
        "run_mean": jnp.zeros((NHIDDEN,), jnp.float32),
        "run_var": jnp.ones((NHIDDEN,), jnp.float32),
        "w2": w2, "b2": b2,
    }


def reference_forward(x, params):
    """Pure-JAX reference of the eval-mode forward pass."""
    h = x @ params["w1"] + params["b1"]
    h = (h - params["run_mean"]) * jax.lax.rsqrt(params["run_var"] + _BN_EPS)
    h = h * params["gamma"] + params["beta"]
    logits = h @ params["w2"] + params["b2"]
    return jax.nn.log_softmax(logits, axis=1)


if __name__ == "__main__":
    key = jax.random.PRNGKey(0)
    k_x, k_p = jax.random.split(key)

    B, idim, odim = 16, 32, 16
    x = jax.random.normal(k_x, (B, idim), jnp.float32)
    params = init_params(k_p, idim, odim)
    ref = reference_forward(x, params)

    # f32 path; B=16 -> TB=8, grid=(2,) exercises tiling + 2 parallel steps.
    prep_f32 = prepare_params(params, compute_dtype=jnp.float32)
    out = fakedetfc_forward(x, prep_f32)
    out = jax.block_until_ready(out)
    assert out.shape == (B, odim)
    assert jnp.allclose(out, ref, atol=1e-5, rtol=1e-5), "f32 mismatch vs reference"
    assert jnp.allclose(jnp.sum(jnp.exp(out), axis=1), 1.0, atol=1e-5)

    # bf16 MXU path (f32 accumulation) -- looser tolerance vs the f32 reference.
    prep_bf16 = prepare_params(params, compute_dtype=jnp.bfloat16)
    out_bf = fakedetfc_forward(x, prep_bf16)
    out_bf = jax.block_until_ready(out_bf)
    assert out_bf.shape == (B, odim)
    assert float(jnp.max(jnp.abs(out_bf - ref))) < 0.25, "bf16 path diverged"
    assert jnp.allclose(jnp.sum(jnp.exp(out_bf), axis=1), 1.0, atol=1e-2)

    print("KERNEL_OK")
</pallas_src>

<mosaic_0001>
module attributes {stable_mosaic.version = 11 : i64} {
  func.func @fakedetfc_kernel(%arg0: i32, %arg1: memref<8x32xf32, #tpu.memory_space<vmem>>, %arg2: memref<32x128xf32, #tpu.memory_space<vmem>>, %arg3: memref<1x128xf32, #tpu.memory_space<vmem>>, %arg4: memref<128x128xf32, #tpu.memory_space<vmem>>, %arg5: memref<1x128xf32, #tpu.memory_space<vmem>>, %arg6: memref<8x16xf32, #tpu.memory_space<vmem>>) attributes {dimension_semantics = [#tpu.dimension_semantics<parallel>], iteration_bounds = array<i64: 2>, scalar_prefetch = 0 : i64, scratch_operands = 0 : i64, tpu.core_type = #tpu.core_type<tc>, window_params = [{transform_indices = @transform_0, window_bounds = array<i64: 8, 32>}, {pipeline_mode = #tpu.pipeline_mode<synchronous>, transform_indices = @transform_1, window_bounds = array<i64: 32, 128>}, {pipeline_mode = #tpu.pipeline_mode<synchronous>, transform_indices = @transform_2, window_bounds = array<i64: 1, 128>}, {pipeline_mode = #tpu.pipeline_mode<synchronous>, transform_indices = @transform_3, window_bounds = array<i64: 128, 128>}, {pipeline_mode = #tpu.pipeline_mode<synchronous>, transform_indices = @transform_4, window_bounds = array<i64: 1, 128>}, {transform_indices = @transform_5, window_bounds = array<i64: 8, 16>}]} {
    %c0 = arith.constant 0 : index
    %c0_0 = arith.constant 0 : index
    %0 = vector.load %arg1[%c0, %c0_0] : memref<8x32xf32, #tpu.memory_space<vmem>>, vector<8x32xf32>
    %c0_1 = arith.constant 0 : index
    %c0_2 = arith.constant 0 : index
    %1 = vector.load %arg2[%c0_1, %c0_2] : memref<32x128xf32, #tpu.memory_space<vmem>>, vector<32x128xf32>
    %cst = arith.constant dense<0.000000e+00> : vector<8x128xf32>
    %2 = tpu.matmul %0, %1, %cst {dimension_numbers = #tpu.dot_dimension_numbers<[1], [0], [0], [1], [0, 0, 1, 1], [], []>} : vector<8x32xf32>, vector<32x128xf32>, vector<8x128xf32> -> vector<8x128xf32>
    %c0_3 = arith.constant 0 : index
    %c0_4 = arith.constant 0 : index
    %3 = vector.load %arg3[%c0_3, %c0_4] : memref<1x128xf32, #tpu.memory_space<vmem>>, vector<1x128xf32>
    %4 = vector.broadcast %3 : vector<1x128xf32> to vector<8x128xf32>
    %5 = arith.addf %2, %4 : vector<8x128xf32>
    %c0_5 = arith.constant 0 : index
    %c0_6 = arith.constant 0 : index
    %6 = vector.load %arg4[%c0_5, %c0_6] : memref<128x128xf32, #tpu.memory_space<vmem>>, vector<128x128xf32>
    %cst_7 = arith.constant dense<0.000000e+00> : vector<8x128xf32>
    %7 = tpu.matmul %5, %6, %cst_7 {dimension_numbers = #tpu.dot_dimension_numbers<[1], [0], [0], [1], [0, 0, 1, 1], [], []>} : vector<8x128xf32>, vector<128x128xf32>, vector<8x128xf32> -> vector<8x128xf32>
    %c0_8 = arith.constant 0 : index
    %c0_9 = arith.constant 0 : index
    %8 = vector.load %arg5[%c0_8, %c0_9] : memref<1x128xf32, #tpu.memory_space<vmem>>, vector<1x128xf32>
    %9 = vector.broadcast %8 : vector<1x128xf32> to vector<8x128xf32>
    %10 = arith.addf %7, %9 : vector<8x128xf32>
    %cst_10 = arith.constant dense<0xFF800000> : vector<8xf32>
    %11 = vector.multi_reduction <maximumf>, %10, %cst_10 [1] : vector<8x128xf32> to vector<8xf32>
    %12 = vector.shape_cast %11 : vector<8xf32> to vector<8x1xf32>
    %13 = vector.broadcast %12 : vector<8x1xf32> to vector<8x128xf32>
    %14 = arith.subf %10, %13 : vector<8x128xf32>
    %15 = math.exp %14 : vector<8x128xf32>
    %cst_11 = arith.constant dense<0.000000e+00> : vector<8xf32>
    %16 = vector.multi_reduction <add>, %15, %cst_11 [1] : vector<8x128xf32> to vector<8xf32>
    %17 = vector.shape_cast %16 : vector<8xf32> to vector<8x1xf32>
    %18 = math.log %17 : vector<8x1xf32>
    %19 = arith.addf %12, %18 : vector<8x1xf32>
    %20 = vector.extract_strided_slice %10 {offsets = [0, 0], sizes = [8, 16], strides = [1, 1]} : vector<8x128xf32> to vector<8x16xf32>
    %21 = vector.broadcast %19 : vector<8x1xf32> to vector<8x16xf32>
    %22 = arith.subf %20, %21 : vector<8x16xf32>
    %c0_12 = arith.constant 0 : index
    %c0_13 = arith.constant 0 : index
    %23 = vector.load %arg6[%c0_12, %c0_13] : memref<8x16xf32, #tpu.memory_space<vmem>>, vector<8x16xf32>
    tpu.vector_store %arg6[%c0_12, %c0_13], %22 {strides = array<i32>} : memref<8x16xf32, #tpu.memory_space<vmem>>, vector<8x16xf32>,
    return
  }
  func.func @transform_0(%arg0: i32) -> (i32, i32) {
    %c0_i32 = arith.constant 0 : i32
    %c0_i32_0 = arith.constant 0 : i32
    return %arg0, %c0_i32 : i32, i32
  }
  func.func @transform_1(%arg0: i32) -> (i32, i32) {
    %c0_i32 = arith.constant 0 : i32
    %c0_i32_0 = arith.constant 0 : i32
    %c0_i32_1 = arith.constant 0 : i32
    return %c0_i32, %c0_i32_0 : i32, i32
  }
  func.func @transform_2(%arg0: i32) -> (i32, i32) {
    %c0_i32 = arith.constant 0 : i32
    %c0_i32_0 = arith.constant 0 : i32
    %c0_i32_1 = arith.constant 0 : i32
    return %c0_i32, %c0_i32_0 : i32, i32
  }
  func.func @transform_3(%arg0: i32) -> (i32, i32) {
    %c0_i32 = arith.constant 0 : i32
    %c0_i32_0 = arith.constant 0 : i32
    %c0_i32_1 = arith.constant 0 : i32
    return %c0_i32, %c0_i32_0 : i32, i32
  }
  func.func @transform_4(%arg0: i32) -> (i32, i32) {
    %c0_i32 = arith.constant 0 : i32
    %c0_i32_0 = arith.constant 0 : i32
    %c0_i32_1 = arith.constant 0 : i32
    return %c0_i32, %c0_i32_0 : i32, i32
  }
  func.func @transform_5(%arg0: i32) -> (i32, i32) {
    %c0_i32 = arith.constant 0 : i32
    %c0_i32_0 = arith.constant 0 : i32
    return %arg0, %c0_i32 : i32, i32
  }
}

module attributes {stable_mosaic.version = 11 : i64} {
  func.func @fakedetfc_kernel(%arg0: i32, %arg1: memref<8x32xf32, #tpu.memory_space<vmem>>, %arg2: memref<32x128xf32, #tpu.memory_space<vmem>>, %arg3: memref<1x128xf32, #tpu.memory_space<vmem>>, %arg4: memref<128x128xf32, #tpu.memory_space<vmem>>, %arg5: memref<1x128xf32, #tpu.memory_space<vmem>>, %arg6: memref<8x16xf32, #tpu.memory_space<vmem>>) attributes {dimension_semantics = [#tpu.dimension_semantics<parallel>], iteration_bounds = array<i64: 2>, scalar_prefetch = 0 : i64, scratch_operands = 0 : i64, tpu.core_type = #tpu.core_type<tc>, window_params = [{transform_indices = @transform_0, window_bounds = array<i64: 8, 32>}, {pipeline_mode = #tpu.pipeline_mode<synchronous>, transform_indices = @transform_1, window_bounds = array<i64: 32, 128>}, {pipeline_mode = #tpu.pipeline_mode<synchronous>, transform_indices = @transform_2, window_bounds = array<i64: 1, 128>}, {pipeline_mode = #tpu.pipeline_mode<synchronous>, transform_indices = @transform_3, window_bounds = array<i64: 128, 128>}, {pipeline_mode = #tpu.pipeline_mode<synchronous>, transform_indices = @transform_4, window_bounds = array<i64: 1, 128>}, {transform_indices = @transform_5, window_bounds = array<i64: 8, 16>}]} {
    %c0 = arith.constant 0 : index
    %c0_0 = arith.constant 0 : index
    %0 = vector.load %arg1[%c0, %c0_0] : memref<8x32xf32, #tpu.memory_space<vmem>>, vector<8x32xf32>
    %c0_1 = arith.constant 0 : index
    %c0_2 = arith.constant 0 : index
    %1 = vector.load %arg2[%c0_1, %c0_2] : memref<32x128xf32, #tpu.memory_space<vmem>>, vector<32x128xf32>
    %cst = arith.constant dense<0.000000e+00> : vector<8x128xf32>
    %2 = tpu.matmul %0, %1, %cst {dimension_numbers = #tpu.dot_dimension_numbers<[1], [0], [0], [1], [0, 0, 1, 1], [], []>} : vector<8x32xf32>, vector<32x128xf32>, vector<8x128xf32> -> vector<8x128xf32>
    %c0_3 = arith.constant 0 : index
    %c0_4 = arith.constant 0 : index
    %3 = vector.load %arg3[%c0_3, %c0_4] : memref<1x128xf32, #tpu.memory_space<vmem>>, vector<1x128xf32>
    %4 = vector.broadcast %3 : vector<1x128xf32> to vector<8x128xf32>
    %5 = arith.addf %2, %4 : vector<8x128xf32>
    %c0_5 = arith.constant 0 : index
    %c0_6 = arith.constant 0 : index
    %6 = vector.load %arg4[%c0_5, %c0_6] : memref<128x128xf32, #tpu.memory_space<vmem>>, vector<128x128xf32>
    %cst_7 = arith.constant dense<0.000000e+00> : vector<8x128xf32>
    %7 = tpu.matmul %5, %6, %cst_7 {dimension_numbers = #tpu.dot_dimension_numbers<[1], [0], [0], [1], [0, 0, 1, 1], [], []>} : vector<8x128xf32>, vector<128x128xf32>, vector<8x128xf32> -> vector<8x128xf32>
    %c0_8 = arith.constant 0 : index
    %c0_9 = arith.constant 0 : index
    %8 = vector.load %arg5[%c0_8, %c0_9] : memref<1x128xf32, #tpu.memory_space<vmem>>, vector<1x128xf32>
    %9 = vector.broadcast %8 : vector<1x128xf32> to vector<8x128xf32>
    %10 = arith.addf %7, %9 : vector<8x128xf32>
    %cst_10 = arith.constant dense<0xFF800000> : vector<8xf32>
    %11 = vector.multi_reduction <maximumf>, %10, %cst_10 [1] : vector<8x128xf32> to vector<8xf32>
    %12 = vector.shape_cast %11 : vector<8xf32> to vector<8x1xf32>
    %13 = vector.broadcast %12 : vector<8x1xf32> to vector<8x128xf32>
    %14 = arith.subf %10, %13 : vector<8x128xf32>
    %15 = math.exp %14 : vector<8x128xf32>
    %cst_11 = arith.constant dense<0.000000e+00> : vector<8xf32>
    %16 = vector.multi_reduction <add>, %15, %cst_11 [1] : vector<8x128xf32> to vector<8xf32>
    %17 = vector.shape_cast %16 : vector<8xf32> to vector<8x1xf32>
    %18 = math.log %17 : vector<8x1xf32>
    %19 = arith.addf %12, %18 : vector<8x1xf32>
    %20 = vector.extract_strided_slice %10 {offsets = [0, 0], sizes = [8, 16], strides = [1, 1]} : vector<8x128xf32> to vector<8x16xf32>
    %21 = vector.broadcast %19 : vector<8x1xf32> to vector<8x16xf32>
    %22 = arith.subf %20, %21 : vector<8x16xf32>
    %c0_12 = arith.constant 0 : index
    %c0_13 = arith.constant 0 : index
    %23 = vector.load %arg6[%c0_12, %c0_13] : memref<8x16xf32, #tpu.memory_space<vmem>>, vector<8x16xf32>
    tpu.vector_store %arg6[%c0_12, %c0_13], %22 {strides = array<i32>} : memref<8x16xf32, #tpu.memory_space<vmem>>, vector<8x16xf32>,
    return
  }
  func.func @transform_0(%arg0: i32) -> (i32, i32) {
    %c0_i32 = arith.constant 0 : i32
    %c0_i32_0 = arith.constant 0 : i32
    return %arg0, %c0_i32 : i32, i32
  }
  func.func @transform_1(%arg0: i32) -> (i32, i32) {
    %c0_i32 = arith.constant 0 : i32
    %c0_i32_0 = arith.constant 0 : i32
    %c0_i32_1 = arith.constant 0 : i32
    return %c0_i32, %c0_i32_0 : i32, i32
  }
  func.func @transform_2(%arg0: i32) -> (i32, i32) {
    %c0_i32 = arith.constant 0 : i32
    %c0_i32_0 = arith.constant 0 : i32
    %c0_i32_1 = arith.constant 0 : i32
    return %c0_i32, %c0_i32_0 : i32, i32
  }
  func.func @transform_3(%arg0: i32) -> (i32, i32) {
    %c0_i32 = arith.constant 0 : i32
    %c0_i32_0 = arith.constant 0 : i32
    %c0_i32_1 = arith.constant 0 : i32
    return %c0_i32, %c0_i32_0 : i32, i32
  }
  func.func @transform_4(%arg0: i32) -> (i32, i32) {
    %c0_i32 = arith.constant 0 : i32
    %c0_i32_0 = arith.constant 0 : i32
    %c0_i32_1 = arith.constant 0 : i32
    return %c0_i32, %c0_i32_0 : i32, i32
  }
  func.func @transform_5(%arg0: i32) -> (i32, i32) {
    %c0_i32 = arith.constant 0 : i32
    %c0_i32_0 = arith.constant 0 : i32
    return %arg0, %c0_i32 : i32, i32
  }
}

</mosaic_0001>

<bundles_post_ra>
// kernel: tpu_custom_call.1
= control target key start
LH: loop header
LB: loop body
LE: loop exit
PB: predicated region body
PF: predicated region fallthrough
CT: control target
= control target key end

     0   :  { %10 = vsyncpa [#allocation3], 0  ;;  %s1196_s0 = inlined_call_operand.hbm [shape: f32[16,32], index: 0, kind: input, shape index: {}]   ;;  %s1197_s1 = inlined_call_operand.hbm [shape: f32[32,128], index: 1, kind: input, shape index: {}]   ;;  %s1198_s2 = inlined_call_operand.vmem [shape: f32[1,128], index: 2, kind: input, shape index: {}]   ;;  %s1199_s3 = inlined_call_operand.hbm [shape: f32[128,128], index: 3, kind: input, shape index: {}]   ;;  %s1200_s4 = inlined_call_operand.vmem [shape: f32[1,128], index: 4, kind: input, shape index: {}]   ;;  %s1201_s5 = inlined_call_operand.hbm [shape: f32[16,16], index: 5, kind: output, shape index: {}]  }
   0x1   :  { %12 = vsyncpa [#allocation3 + $0x1], 0 }
   0x2   :  { %13 = vsyncpa [#allocation6], 0 }
   0x3   :  { %14 = vsyncpa [#allocation4], 0 }
   0x4   :  { %16 = vsyncpa [#allocation4 + $0x1], 0  ;;  %s954_s18 = smov 0   ;;  %s956_s19 = smov 0  }
   0x5   :  { %s958_s20 = smov 0   ;;  %s960_s21 = smov 0  }
   0x6 LB: > { %s975_s22 = sadd.s32 4294967295, %s913_s21   ;;  %s564_s23 = sadd.s32 4294967294, %s913_s21   ;;  %s913_s21 = sphi %s960_s21, %s1221_s21   ;;  %s909_s20 = sphi %s958_s20, %s1220_s20   ;;  %s905_s19 = sphi %s956_s19, %s1219_s19   ;;  %s901_s18 = sphi %s954_s18, %s1218_s18  }
   0x7   : > { %p42_p0 = scmp.ne.s32.totalorder %s905_s19, %s901_s18  ;;  %p1202_p1 = scmp.eq.s32.totalorder %s975_s22, 0 }
   0x8   : > { %p156_p3 = scmp.eq.s32.totalorder %s564_s23, 1  ;;  %p565_p5 = scmp.ge.s32.totalorder %s913_s21, 1 }
   0x9   : > { %p984_p4 = por %p1202_p1, %p42_p0  ;;  %p163_p7 = scmp.lt.s32.totalorder %s913_s21, 3 }
   0xa   : > { %p989_p6 = por %p156_p3, %p42_p0  ;;  %s915_s27 = smov [#allocation5]  }
   0xb   : > { %s1205_s24 = scalar_select %p984_p4, 1, 0 }
   0xc   : > { %s1206_s25 = scalar_select %p989_p6, 1, 0 }
   0xd   : > { %p994_p8 = pnand %p565_p5, %p163_p7  ;;  %s175_s28 = sshll.u32 %s915_s27, 4  ;;  %s998_s28 = int_to_ptr.vmem [resolvable:$true] %s175_s28 }
   0xe   : > { %s916_s30 = smov [#allocation7]   ;;  %s757_s9 = scalar_lea.hbm %s1197_s1, 512 }
   0xf   : > { %p693_p9 = pneg %p994_p8  ;;  %s191_s6 = sshll.u32 %s916_s30, 4  ;;  %s1009_s6 = int_to_ptr.vmem [resolvable:$true] %s191_s6 }
  0x10   : > { %p758_p12 = scmp.ne.s32.totalorder %s1197_s1, %s757_s9  ;;  %p764_p5 = scmp.lt.u32.totalorder %s757_s9, %s1197_s1 }
  0x11   : > { %p1005_p11 = pnand %p693_p9, %p1202_p1 }
  0x13   : > { %p759_p13 = pneg %p1005_p11 }
  0x15   : > { %p760_p0 = pnand %p759_p13, %p758_p12 }
  0x17   : > { %p761_p3 = pneg %p760_p0 }
  0x19   : > { %p766_p7 = pnand %p764_p5, %p761_p3 }
  0x1b   : > { %769 = shalt.err (!%p766_p7)
}
  0x1c   : > { %s770_s14 = scalar_lea.vmem %s998_s28, 512  ;;  %p778_p2 = scmp.lt.s32.totalorder %s998_s28, %s998_s28 }
  0x1d   : > { %p771_p9 = scmp.ne.s32.totalorder %s998_s28, %s770_s14  ;;  %p779_p12 = scmp.lt.s32.totalorder %s770_s14, %s770_s14 }
  0x1f   : > { %p773_p10 = pnand %p771_p9, %p759_p13  ;;  %p780_p0 = por %p779_p12, %p778_p2 }
  0x21   : > { %p774_p1 = pneg %p773_p10 }
  0x23   : > { %p781_p6 = pnand %p780_p0, %p774_p1 }
  0x25   : > { %784 = shalt.err (!%p781_p6)
}
  0x26   : > { %s917_s15 = smov 128   ;;  %s918_s16 = smov 8  }
  0x27   : > { %696 = dma.hbm_to_vmem [thread:$0]  (!%p1005_p11), %s1197_s1, 512, %s998_s28, [#allocation6], %s917_s15, %s917_s15, %s918_s16  }
  0x28   : > { %s785_s7 = scalar_lea.hbm %s1199_s3, 2048 }
  0x29   : > { %p786_p2 = scmp.ne.s32.totalorder %s1199_s3, %s785_s7  ;;  %p792_p10 = scmp.lt.u32.totalorder %s785_s7, %s1199_s3 }
  0x2b   : > { %p788_p1 = pnand %p786_p2, %p759_p13 }
  0x2d   : > { %p789_p6 = pneg %p788_p1 }
  0x2f   : > { %p794_p3 = pnand %p792_p10, %p789_p6 }
  0x31   : > { %797 = shalt.err (!%p794_p3)
}
  0x32   : > { %s798_s28 = scalar_lea.vmem %s1009_s6, 2048  ;;  %p806_p12 = scmp.lt.s32.totalorder %s1009_s6, %s1009_s6 }
  0x33   : > { %p799_p5 = scmp.ne.s32.totalorder %s1009_s6, %s798_s28  ;;  %p807_p0 = scmp.lt.s32.totalorder %s798_s28, %s798_s28 }
  0x35   : > { %p801_p7 = pnand %p799_p5, %p759_p13  ;;  %p808_p2 = por %p807_p0, %p806_p12 }
  0x37   : > { %p802_p9 = pneg %p801_p7 }
  0x39   : > { %p809_p1 = pnand %p808_p2, %p802_p9 }
  0x3b   : > { %812 = shalt.err (!%p809_p1)
}
  0x3c   : > { %699 = dma.hbm_to_vmem [thread:$0]  (!%p1005_p11), %s1199_s3, 2048, %s1009_s6, [#allocation6], %s917_s15, %s917_s15, %s918_s16  }
  0x3d   : > { %s1064_s14 = sadd.s32 1, %s913_s21   ;;  %s29_s29 = sadd.s32 1, %s909_s20 }
  0x3e   : > { %s26_s17 = ssub.s32 %s913_s21, %s1064_s14  ;;  %p36_p13 = scmp.ne.s32.totalorder %s909_s20, %s905_s19 }
  0x3f   : > { %p27_p6 = scmp.eq.s32.totalorder %s26_s17, 0  ;;  %p37_p10 = scmp.eq.s32.totalorder %s913_s21, 0 }
  0x40   : > { %p1209_p3 = scmp.eq.s32.totalorder %s975_s22, 1  ;;  %p710_p7 = scmp.lt.s32.totalorder %s913_s21, 2 }
  0x41   : > { %s1080_s27 = scalar_select %p27_p6, %s909_s20, %s29_s29  }
  0x42   : > { %p1074_p5 = por %p1209_p3, %p36_p13  ;;  %p38_p9 = por %p37_p10, %p36_p13 }
  0x43   : > { %s208_s30 = sand.u32 1, %s909_s20   ;;  %s570_s6 = sshll.u32 %s913_s21, 7 }
  0x44   : > { %s1210_s23 = scalar_select %p1074_p5, 1, 0 }
  0x45   : > { %s569_s7 = sshll.u32 %s208_s30, 3  ;;  %s1087_s8 = scalar_lea.hbm %s1196_s0, %s570_s6 }
  0x46   : > { %s212_s9 = scalar_lea.vmem [#allocation2], %s569_s7  ;;  %p1091_p11 = pnand %p710_p7, %p38_p9 }
  0x47   : > { %s219_s10 = sshll.u32 %s212_s9, 4  ;;  %s209_s28 = scalar_lea.sflag [#allocation3], %s208_s30  ;;  %s1089_s10 = int_to_ptr.vmem [resolvable:$true] %s219_s10 }
  0x48   : > { %s813_s12 = scalar_lea.hbm %s1087_s8, 128  ;;  %p815_p0 = pneg %p1091_p11 }
  0x49   : > { %p814_p12 = scmp.ne.s32.totalorder %s1087_s8, %s813_s12  ;;  %s818_s17 = scalar_lea.hbm %s1196_s0, 256 }
  0x4a   : > { %p819_p13 = scmp.lt.u32.totalorder %s1087_s8, %s1196_s0  ;;  %p820_p6 = scmp.lt.u32.totalorder %s818_s17, %s813_s12 }
  0x4b   : > { %p816_p2 = pnand %p815_p0, %p814_p12  ;;  %p822_p3 = scmp.lt.u32.totalorder %s813_s12, %s1087_s8 }
  0x4c   : > { %p821_p10 = por %p820_p6, %p819_p13 }
  0x4d   : > { %p817_p1 = pneg %p816_p2 }
  0x4e   : > { %p823_p7 = por %p822_p3, %p821_p10 }
  0x50   : > { %p824_p9 = pnand %p823_p7, %p817_p1 }
  0x52   : > { %827 = shalt.err (!%p824_p9)
}
  0x53   : > { %s828_s30 = scalar_lea.vmem %s1089_s10, 128  ;;  %s919_s15 = smov [#allocation2]  }
  0x54   : > { %p829_p12 = scmp.ne.s32.totalorder %s1089_s10, %s828_s30  ;;  %s833_s16 = sshll.u32 %s919_s15, 4  ;;  %s834_s16 = int_to_ptr.vmem [resolvable:$false] %s833_s16 }
  0x55   : > { %s835_s9 = scalar_lea.vmem %s834_s16, 256  ;;  %p836_p4 = scmp.lt.s32.totalorder %s1089_s10, %s834_s16 }
  0x56   : > { %p831_p2 = pnand %p829_p12, %p815_p0  ;;  %p837_p13 = scmp.lt.s32.totalorder %s835_s9, %s828_s30 }
  0x58   : > { %p832_p5 = pneg %p831_p2  ;;  %p838_p6 = por %p837_p13, %p836_p4 }
  0x5a   : > { %p839_p10 = pnand %p838_p6, %p832_p5 }
  0x5c   : > { %842 = shalt.err (!%p839_p10)
}
  0x5d   : > { %703 = dma.hbm_to_vmem [thread:$0]  (!%p1091_p11), %s1087_s8, 128, %s1089_s10, %s209_s28  }
  0x5e   : > { %228 = sbr.rel (%p994_p8) target bundleno = 873 (0x369), region = 40  ;;  %s1123_s12 = sand.u32 (!%p994_p8), 1, %s905_s19  }
  0x5f   : > { %s572_s13 = sshll.u32 (!%p994_p8), %s1123_s12, 3  ;;  %s231_s29 = scalar_lea.sflag (!%p994_p8), [#allocation3], %s1123_s12 }
  0x60   : > { %s1129_s17 = scalar_lea.vmem (!%p994_p8), [#allocation2], %s572_s13  ;;  %p1212_p4 = scmp.ne.s32.totalorder (!%p994_p8), %s1205_s24, 0 }
  0x65   : > { %888 = dma.done.wait (%p1212_p4), %s231_s29, 128  }
  0x66   : > { %890 = vsyncadd (%p1212_p4), %s231_s29, 4294967168  ;;  %p1213_p5 = scmp.eq.s32.totalorder %s975_s22, 0 }
  0x68   : > { %892 = dma.done.wait (%p1213_p5), [#allocation6], 2560   ;;  %p1214_p8 = pmov %p1213_p5 }
  0x69   : > { %v920_v0 = vmov 0.0|0.0   ;;  %vm921_vm0 = vmmov 0   ;;  %v922_v1 = vmov 0.0   ;;  %v270_v2 = vld [vmem:[#allocation5] sm:$0xff]  ;;  %v271_v3 = vld [vmem:[#allocation5 + $0x8] sm:$0xff]  ;;  %v272_v4 = vld [vmem:[#allocation5 + $0x10] sm:$0xff] }
  0x6a   : > { %894 = vsyncadd (%p1214_p8), [#allocation6], 4294964736  ;;  %651 = vmatprep.subr.bf16.mxu0 %v920_v0  ;;  %613 = vmatprep.mubr.msk.f32.mxu0 %vm921_vm0, %v922_v1  ;;  %v652_v5 = vpack.c.bf16 %v271_v3, %v270_v2  ;;  %v273_v6 = vld [vmem:[#allocation5 + $0x18] sm:$0xff]  ;;  %v355_v7 = vld [vmem:[#allocation7] sm:$0xff]  ;;  %vm281_vm1 = vcmask 261120   ;;  %s580_s11 = sshll.u32 %s975_s22, 7 }
  0x6b   : > { %657 = vmatprep.subr.bf16.mxu1 %v920_v0  ;;  %648 = vmatprep.mubr.msk.f32.mxu1 %vm921_vm0, %v922_v1  ;;  %v356_v8 = vld [vmem:[#allocation7 + $0x8] sm:$0xff]  ;;  %v357_v9 = vld [vmem:[#allocation7 + $0x10] sm:$0xff]  ;;  %v358_v10 = vld [vmem:[#allocation7 + $0x18] sm:$0xff]  ;;  %v655_v11 = vpack.c.bf16 %v273_v6, %v272_v4  ;;  %s268_s28 = scalar_lea.vmem [#allocation8], %s572_s13  ;;  %vm459_vm2 = vcmask 130048   ;;  %s1152_s15 = scalar_lea.hbm %s1201_s5, %s580_s11 }
  0x6c   : > { %653 = vmatpush3.bf16.msra.mxu0 %v652_v5  ;;  %v658_v12 = vpack.c.bf16 %v356_v8, %v355_v7  ;;  %v661_v13 = vpack.c.bf16 %v358_v10, %v357_v9  ;;  %v359_v14 = vld [vmem:[#allocation7 + $0x20] sm:$0xff]  ;;  %v360_v15 = vld [vmem:[#allocation7 + $0x28] sm:$0xff]  ;;  %v269_v16 = vld [vmem:[%s1129_s17] sm:$0xff]  ;;  %s475_s7 = sshll.u32 %s268_s28, 4  ;;  %s462_s16 = scalar_lea.sflag [#allocation4], %s1123_s12  ;;  %s1154_s7 = int_to_ptr.vmem [resolvable:$true] %s475_s7 }
  0x6d   : > { %654 = vmatprep.subr.bf16.mxu0 %v920_v0  ;;  %v664_v17 = vpack.c.bf16 %v360_v15, %v359_v14  ;;  %v361_v18 = vld [vmem:[#allocation7 + $0x30] sm:$0xff]  ;;  %v362_v19 = vld [vmem:[#allocation7 + $0x38] sm:$0xff]  ;;  %v363_v21 = vld [vmem:[#allocation7 + $0x40] sm:$0xff]  ;;  %s843_s9 = scalar_lea.vmem %s1154_s7, 128  ;;  %p1215_p0 = scmp.ne.s32.totalorder %s1210_s23, 0 }
  0x6e   : > { %659 = vmatpush3.bf16.msra.mxu1 %v658_v12  ;;  %v667_v20 = vpack.c.bf16 %v362_v19, %v361_v18  ;;  %v364_v22 = vld [vmem:[#allocation7 + $0x48] sm:$0xff]  ;;  %v365_v24 = vld [vmem:[#allocation7 + $0x50] sm:$0xff]  ;;  %v366_v25 = vld [vmem:[#allocation7 + $0x58] sm:$0xff]  ;;  %p844_p11 = scmp.ne.s32.totalorder %s1154_s7, %s843_s9  ;;  %s923_s22 = smov [#allocation8]  }
  0x6f   : > { %660 = vmatprep.subr.bf16.mxu1 %v920_v0  ;;  %v670_v23 = vpack.c.bf16 %v364_v22, %v363_v21  ;;  %v673_v26 = vpack.c.bf16 %v366_v25, %v365_v24  ;;  %v367_v27 = vld [vmem:[#allocation7 + $0x60] sm:$0xff]  ;;  %v368_v28 = vld [vmem:[#allocation7 + $0x68] sm:$0xff]  ;;  %v369_v30 = vld [vmem:[#allocation7 + $0x70] sm:$0xff]  ;;  %s847_s13 = sshll.u32 %s923_s22, 4  ;;  %s848_s13 = int_to_ptr.vmem [resolvable:$false] %s847_s13 }
  0x70   : > { %656 = vmatpush3.bf16.msra.mxu0 %v655_v11  ;;  %v676_v29 = vpack.c.bf16 %v368_v28, %v367_v27  ;;  %v370_v31 = vld [vmem:[#allocation7 + $0x78] sm:$0xff]  ;;  %v576_v33 = vld [vmem:[%s1198_s2] ss:$0 sm:$0xff]  ;;  %p845_p1 = pnand %p844_p11, %p1215_p0  ;;  %s849_s29 = scalar_lea.vmem %s848_s13, 256 }
  0x71   : > { %v679_v32 = vpack.c.bf16 %v370_v31, %v369_v30  ;;  %v578_v37 = vld [vmem:[%s1200_s4] ss:$0 sm:$0xff]  ;;  %p850_p7 = scmp.lt.s32.totalorder %s1154_s7, %s848_s13  ;;  %p851_p9 = scmp.lt.s32.totalorder %s849_s29, %s843_s9 }
  0x72   : > { %662 = vmatpush3.bf16.msra.mxu1 %v661_v13  ;;  %p846_p3 = pneg %p845_p1 }
  0x73   : > { %614 = vmatmul.mubr.msk.f32.vlgmr.msra.gmra.mrb[0].mxu0 %vm281_vm1, %v269_v16  ;;  %663 = vmatprep.subr.bf16.mxu1 %v920_v0  ;;  %p852_p12 = por %p851_p9, %p850_p7 }
  0x75   : > { %p853_p2 = pnand %p852_p12, %p846_p3 }
  0x76   : > { %665 = vmatpush3.bf16.msra.mxu1 %v664_v17 }
  0x77   : > { %666 = vmatprep.subr.bf16.mxu1 %v920_v0 }
  0x7a   : > { %668 = vmatpush3.bf16.msra.mxu1 %v667_v20 }
  0x7b   : > { %669 = vmatprep.subr.bf16.mxu1 %v920_v0 }
  0x7e   : > { %671 = vmatpush3.bf16.msra.mxu1 %v670_v23 }
  0x7f   : > { %672 = vmatprep.subr.bf16.mxu1 %v920_v0 }
  0x82   : > { %674 = vmatpush3.bf16.msra.mxu1 %v673_v26 }
  0x83   : > { %675 = vmatprep.subr.bf16.mxu1 %v920_v0 }
  0x86   : > { %677 = vmatpush3.bf16.msra.mxu1 %v676_v29 }
  0x87   : > { %678 = vmatprep.subr.bf16.mxu1 %v920_v0 }
  0x8a   : > { %680 = vmatpush3.bf16.msra.mxu1 %v679_v32 }
 0x146   : > { %v351_v34 = vpop.f32.mrb[0].mxu0 }
 0x147   : > { %v352_v35 = vadd.f32 %v576_v33, %v351_v34  ;;  %v615_v36 = vpop.f32.mrb[1].mxu0 }
 0x149   : > { %649 = vmatmul.mubr.f32.vlgmr.msra.gmra.mrb[0].mxu1 %v352_v35 }
 0x21c   : > { %v444_v38 = vpop.f32.mrb[0].mxu1 }
 0x21d   : > { %v445_v39 = vadd.f32 %v578_v37, %v444_v38  ;;  %v650_v40 = vpop.f32.mrb[1].mxu1 }
 0x21f   : > { %448 = vmax.xlane.f32.xlu0 %v445_v39 }
 0x2ac   : > { %v449_v41 = vpop.xlane.xlu0 %448 }
 0x2ad   : > { %v450_v42 = vsub.f32 %v445_v39, %v449_v41 }
 0x2af   : > { %v451_v43 = vmul.f32 1.442695, %v450_v42 }
 0x2b1   : > { %753 = vpow2.f32 %v451_v43 }
 0x2bb   : > { %v754_v44 = vpop.eup %753 }
 0x2bc   : > { %453 = vadd.xlane.f32.xlu0 %v754_v44 }
 0x349   : > { %v454_v45 = vpop.xlane.xlu0 %453 }
 0x34a   : > { %755 = vlog2.f32 %v454_v45 }
 0x354   : > { %v756_v46 = vpop.eup %755 }
 0x355   : > { %v456_v47 = vmul.f32 0.6931472, %v756_v46 }
 0x357   : > { %v457_v48 = vadd.f32 %v456_v47, %v449_v41 }
 0x359   : > { %v458_v49 = vsub.f32 %v445_v39, %v457_v48 }
 0x35b   : > { %460 = vst.msk [vmem:[%s268_s28] sm:$0xff] %vm459_vm2, %v458_v49 }
 0x35c   : > { %856 = shalt.err (!%p853_p2)
}
 0x35d   : > { %s857_s12 = scalar_lea.hbm %s1152_s15, 128  ;;  %s861_s26 = scalar_lea.hbm %s1201_s5, 256 }
 0x35e   : > { %p858_p13 = scmp.ne.s32.totalorder %s1152_s15, %s857_s12  ;;  %p862_p4 = scmp.lt.u32.totalorder %s1152_s15, %s1201_s5 }
 0x35f   : > { %p863_p5 = scmp.lt.u32.totalorder %s861_s26, %s857_s12  ;;  %p865_p11 = scmp.lt.u32.totalorder %s857_s12, %s1152_s15 }
 0x360   : > { %p859_p6 = pnand %p858_p13, %p1215_p0 }
 0x361   : > { %p864_p8 = por %p863_p5, %p862_p4 }
 0x362   : > { %p860_p10 = pneg %p859_p6 }
 0x363   : > { %p866_p1 = por %p865_p11, %p864_p8 }
 0x365   : > { %p867_p3 = pnand %p866_p1, %p860_p10 }
 0x367   : > { %870 = shalt.err (!%p867_p3)
}
 0x368   : > { %691 = dma.vmem_to_hbm [thread:$0]  (%p1215_p0), %s1154_s7, 128, %s1152_s15, %s462_s16  }
 0x369 PF: > { %s487_s11 = sand.u32 1, %s901_s18   ;;  %p1216_p7 = scmp.ne.s32.totalorder %s1206_s25, 0 }
 0x36a   : > { %p1217_p9 = scmp.ge.s32.totalorder %s913_s21, 2  ;;  %s488_s28 = scalar_lea.sflag [#allocation4], %s487_s11 }
 0x36c   : > { %p705_p12 = pnand %p1217_p9, %p1216_p7 }
 0x36e   : > { %896 = dma.done.wait (!%p705_p12), %s488_s28, 128  }
 0x36f   : > { %898 = vsyncadd (!%p705_p12), %s488_s28, 4294967168  ;;  %p19_p2 = scmp.ge.s32.totalorder %s1064_s14, 4   ;;  %s1218_s18 = smov %s905_s19 }
 0x370   : > { %s1219_s19 = smov %s909_s20  ;;  %s1220_s20 = smov %s1080_s27 }
 0x371   : > { %s1221_s21 = smov %s1064_s14  ;;  %21 = sbr.rel (!%p19_p2) target bundleno = 6 (0x6), region = 93 }
 0x378   :  { %493 = vsyncpa [#allocation3], 1 }
 0x379   :  { %495 = vsyncpa [#allocation3 + $0x1], 1 }
 0x37a   :  { %496 = vsyncpa [#allocation6], 1 }
 0x37b   :  { %497 = vsyncpa [#allocation4], 1 }
 0x37c   :  { %499 = vsyncpa [#allocation4 + $0x1], 1 }

// kernel: tpu_custom_call.1
= control target key start
LH: loop header
LB: loop body
LE: loop exit
PB: predicated region body
PF: predicated region fallthrough
CT: control target
= control target key end

     0   :  { %10 = vsyncpa [#allocation3], 0  ;;  %s1196_s0 = inlined_call_operand.hbm [shape: f32[16,32], index: 0, kind: input, shape index: {}]   ;;  %s1197_s1 = inlined_call_operand.hbm [shape: f32[32,128], index: 1, kind: input, shape index: {}]   ;;  %s1198_s2 = inlined_call_operand.vmem [shape: f32[1,128], index: 2, kind: input, shape index: {}]   ;;  %s1199_s3 = inlined_call_operand.hbm [shape: f32[128,128], index: 3, kind: input, shape index: {}]   ;;  %s1200_s4 = inlined_call_operand.vmem [shape: f32[1,128], index: 4, kind: input, shape index: {}]   ;;  %s1201_s5 = inlined_call_operand.hbm [shape: f32[16,16], index: 5, kind: output, shape index: {}]  }
   0x1   :  { %12 = vsyncpa [#allocation3 + $0x1], 0 }
   0x2   :  { %13 = vsyncpa [#allocation6], 0 }
   0x3   :  { %14 = vsyncpa [#allocation4], 0 }
   0x4   :  { %16 = vsyncpa [#allocation4 + $0x1], 0  ;;  %s954_s18 = smov 0   ;;  %s956_s19 = smov 0  }
   0x5   :  { %s958_s20 = smov 0   ;;  %s960_s21 = smov 0  }
   0x6 LB: > { %s975_s22 = sadd.s32 4294967295, %s913_s21   ;;  %s564_s23 = sadd.s32 4294967294, %s913_s21   ;;  %s913_s21 = sphi %s960_s21, %s1221_s21   ;;  %s909_s20 = sphi %s958_s20, %s1220_s20   ;;  %s905_s19 = sphi %s956_s19, %s1219_s19   ;;  %s901_s18 = sphi %s954_s18, %s1218_s18  }
   0x7   : > { %p42_p0 = scmp.ne.s32.totalorder %s905_s19, %s901_s18  ;;  %p1202_p1 = scmp.eq.s32.totalorder %s975_s22, 0 }
   0x8   : > { %p156_p3 = scmp.eq.s32.totalorder %s564_s23, 1  ;;  %p565_p5 = scmp.ge.s32.totalorder %s913_s21, 1 }
   0x9   : > { %p984_p4 = por %p1202_p1, %p42_p0  ;;  %p163_p7 = scmp.lt.s32.totalorder %s913_s21, 3 }
   0xa   : > { %p989_p6 = por %p156_p3, %p42_p0  ;;  %s915_s27 = smov [#allocation5]  }
   0xb   : > { %s1205_s24 = scalar_select %p984_p4, 1, 0 }
   0xc   : > { %s1206_s25 = scalar_select %p989_p6, 1, 0 }
   0xd   : > { %p994_p8 = pnand %p565_p5, %p163_p7  ;;  %s175_s28 = sshll.u32 %s915_s27, 4  ;;  %s998_s28 = int_to_ptr.vmem [resolvable:$true] %s175_s28 }
   0xe   : > { %s916_s30 = smov [#allocation7]   ;;  %s757_s9 = scalar_lea.hbm %s1197_s1, 512 }
   0xf   : > { %p693_p9 = pneg %p994_p8  ;;  %s191_s6 = sshll.u32 %s916_s30, 4  ;;  %s1009_s6 = int_to_ptr.vmem [resolvable:$true] %s191_s6 }
  0x10   : > { %p758_p12 = scmp.ne.s32.totalorder %s1197_s1, %s757_s9  ;;  %p764_p5 = scmp.lt.u32.totalorder %s757_s9, %s1197_s1 }
  0x11   : > { %p1005_p11 = pnand %p693_p9, %p1202_p1 }
  0x13   : > { %p759_p13 = pneg %p1005_p11 }
  0x15   : > { %p760_p0 = pnand %p759_p13, %p758_p12 }
  0x17   : > { %p761_p3 = pneg %p760_p0 }
  0x19   : > { %p766_p7 = pnand %p764_p5, %p761_p3 }
  0x1b   : > { %769 = shalt.err (!%p766_p7)
}
  0x1c   : > { %s770_s14 = scalar_lea.vmem %s998_s28, 512  ;;  %p778_p2 = scmp.lt.s32.totalorder %s998_s28, %s998_s28 }
  0x1d   : > { %p771_p9 = scmp.ne.s32.totalorder %s998_s28, %s770_s14  ;;  %p779_p12 = scmp.lt.s32.totalorder %s770_s14, %s770_s14 }
  0x1f   : > { %p773_p10 = pnand %p771_p9, %p759_p13  ;;  %p780_p0 = por %p779_p12, %p778_p2 }
  0x21   : > { %p774_p1 = pneg %p773_p10 }
  0x23   : > { %p781_p6 = pnand %p780_p0, %p774_p1 }
  0x25   : > { %784 = shalt.err (!%p781_p6)
}
  0x26   : > { %s917_s15 = smov 128   ;;  %s918_s16 = smov 8  }
  0x27   : > { %696 = dma.hbm_to_vmem [thread:$0]  (!%p1005_p11), %s1197_s1, 512, %s998_s28, [#allocation6], %s917_s15, %s917_s15, %s918_s16  }
  0x28   : > { %s785_s7 = scalar_lea.hbm %s1199_s3, 2048 }
  0x29   : > { %p786_p2 = scmp.ne.s32.totalorder %s1199_s3, %s785_s7  ;;  %p792_p10 = scmp.lt.u32.totalorder %s785_s7, %s1199_s3 }
  0x2b   : > { %p788_p1 = pnand %p786_p2, %p759_p13 }
  0x2d   : > { %p789_p6 = pneg %p788_p1 }
  0x2f   : > { %p794_p3 = pnand %p792_p10, %p789_p6 }
  0x31   : > { %797 = shalt.err (!%p794_p3)
}
  0x32   : > { %s798_s28 = scalar_lea.vmem %s1009_s6, 2048  ;;  %p806_p12 = scmp.lt.s32.totalorder %s1009_s6, %s1009_s6 }
  0x33   : > { %p799_p5 = scmp.ne.s32.totalorder %s1009_s6, %s798_s28  ;;  %p807_p0 = scmp.lt.s32.totalorder %s798_s28, %s798_s28 }
  0x35   : > { %p801_p7 = pnand %p799_p5, %p759_p13  ;;  %p808_p2 = por %p807_p0, %p806_p12 }
  0x37   : > { %p802_p9 = pneg %p801_p7 }
  0x39   : > { %p809_p1 = pnand %p808_p2, %p802_p9 }
  0x3b   : > { %812 = shalt.err (!%p809_p1)
}
  0x3c   : > { %699 = dma.hbm_to_vmem [thread:$0]  (!%p1005_p11), %s1199_s3, 2048, %s1009_s6, [#allocation6], %s917_s15, %s917_s15, %s918_s16  }
  0x3d   : > { %s1064_s14 = sadd.s32 1, %s913_s21   ;;  %s29_s29 = sadd.s32 1, %s909_s20 }
  0x3e   : > { %s26_s17 = ssub.s32 %s913_s21, %s1064_s14  ;;  %p36_p13 = scmp.ne.s32.totalorder %s909_s20, %s905_s19 }
  0x3f   : > { %p27_p6 = scmp.eq.s32.totalorder %s26_s17, 0  ;;  %p37_p10 = scmp.eq.s32.totalorder %s913_s21, 0 }
  0x40   : > { %p1209_p3 = scmp.eq.s32.totalorder %s975_s22, 1  ;;  %p710_p7 = scmp.lt.s32.totalorder %s913_s21, 2 }
  0x41   : > { %s1080_s27 = scalar_select %p27_p6, %s909_s20, %s29_s29  }
  0x42   : > { %p1074_p5 = por %p1209_p3, %p36_p13  ;;  %p38_p9 = por %p37_p10, %p36_p13 }
  0x43   : > { %s208_s30 = sand.u32 1, %s909_s20   ;;  %s570_s6 = sshll.u32 %s913_s21, 7 }
  0x44   : > { %s1210_s23 = scalar_select %p1074_p5, 1, 0 }
  0x45   : > { %s569_s7 = sshll.u32 %s208_s30, 3  ;;  %s1087_s8 = scalar_lea.hbm %s1196_s0, %s570_s6 }
  0x46   : > { %s212_s9 = scalar_lea.vmem [#allocation2], %s569_s7  ;;  %p1091_p11 = pnand %p710_p7, %p38_p9 }
  0x47   : > { %s219_s10 = sshll.u32 %s212_s9, 4  ;;  %s209_s28 = scalar_lea.sflag [#allocation3], %s208_s30  ;;  %s1089_s10 = int_to_ptr.vmem [resolvable:$true] %s219_s10 }
  0x48   : > { %s813_s12 = scalar_lea.hbm %s1087_s8, 128  ;;  %p815_p0 = pneg %p1091_p11 }
  0x49   : > { %p814_p12 = scmp.ne.s32.totalorder %s1087_s8, %s813_s12  ;;  %s818_s17 = scalar_lea.hbm %s1196_s0, 256 }
  0x4a   : > { %p819_p13 = scmp.lt.u32.totalorder %s1087_s8, %s1196_s0  ;;  %p820_p6 = scmp.lt.u32.totalorder %s818_s17, %s813_s12 }
  0x4b   : > { %p816_p2 = pnand %p815_p0, %p814_p12  ;;  %p822_p3 = scmp.lt.u32.totalorder %s813_s12, %s1087_s8 }
  0x4c   : > { %p821_p10 = por %p820_p6, %p819_p13 }
  0x4d   : > { %p817_p1 = pneg %p816_p2 }
  0x4e   : > { %p823_p7 = por %p822_p3, %p821_p10 }
  0x50   : > { %p824_p9 = pnand %p823_p7, %p817_p1 }
  0x52   : > { %827 = shalt.err (!%p824_p9)
}
  0x53   : > { %s828_s30 = scalar_lea.vmem %s1089_s10, 128  ;;  %s919_s15 = smov [#allocation2]  }
  0x54   : > { %p829_p12 = scmp.ne.s32.totalorder %s1089_s10, %s828_s30  ;;  %s833_s16 = sshll.u32 %s919_s15, 4  ;;  %s834_s16 = int_to_ptr.vmem [resolvable:$false] %s833_s16 }
  0x55   : > { %s835_s9 = scalar_lea.vmem %s834_s16, 256  ;;  %p836_p4 = scmp.lt.s32.totalorder %s1089_s10, %s834_s16 }
  0x56   : > { %p831_p2 = pnand %p829_p12, %p815_p0  ;;  %p837_p13 = scmp.lt.s32.totalorder %s835_s9, %s828_s30 }
  0x58   : > { %p832_p5 = pneg %p831_p2  ;;  %p838_p6 = por %p837_p13, %p836_p4 }
  0x5a   : > { %p839_p10 = pnand %p838_p6, %p832_p5 }
  0x5c   : > { %842 = shalt.err (!%p839_p10)
}
  0x5d   : > { %703 = dma.hbm_to_vmem [thread:$0]  (!%p1091_p11), %s1087_s8, 128, %s1089_s10, %s209_s28  }
  0x5e   : > { %228 = sbr.rel (%p994_p8) target bundleno = 873 (0x369), region = 40  ;;  %s1123_s12 = sand.u32 (!%p994_p8), 1, %s905_s19  }
  0x5f   : > { %s572_s13 = sshll.u32 (!%p994_p8), %s1123_s12, 3  ;;  %s231_s29 = scalar_lea.sflag (!%p994_p8), [#allocation3], %s1123_s12 }
  0x60   : > { %s1129_s17 = scalar_lea.vmem (!%p994_p8), [#allocation2], %s572_s13  ;;  %p1212_p4 = scmp.ne.s32.totalorder (!%p994_p8), %s1205_s24, 0 }
  0x65   : > { %888 = dma.done.wait (%p1212_p4), %s231_s29, 128  }
  0x66   : > { %890 = vsyncadd (%p1212_p4), %s231_s29, 4294967168  ;;  %p1213_p5 = scmp.eq.s32.totalorder %s975_s22, 0 }
  0x68   : > { %892 = dma.done.wait (%p1213_p5), [#allocation6], 2560   ;;  %p1214_p8 = pmov %p1213_p5 }
  0x69   : > { %v920_v0 = vmov 0.0|0.0   ;;  %vm921_vm0 = vmmov 0   ;;  %v922_v1 = vmov 0.0   ;;  %v270_v2 = vld [vmem:[#allocation5] sm:$0xff]  ;;  %v271_v3 = vld [vmem:[#allocation5 + $0x8] sm:$0xff]  ;;  %v272_v4 = vld [vmem:[#allocation5 + $0x10] sm:$0xff] }
  0x6a   : > { %894 = vsyncadd (%p1214_p8), [#allocation6], 4294964736  ;;  %651 = vmatprep.subr.bf16.mxu0 %v920_v0  ;;  %613 = vmatprep.mubr.msk.f32.mxu0 %vm921_vm0, %v922_v1  ;;  %v652_v5 = vpack.c.bf16 %v271_v3, %v270_v2  ;;  %v273_v6 = vld [vmem:[#allocation5 + $0x18] sm:$0xff]  ;;  %v355_v7 = vld [vmem:[#allocation7] sm:$0xff]  ;;  %vm281_vm1 = vcmask 261120   ;;  %s580_s11 = sshll.u32 %s975_s22, 7 }
  0x6b   : > { %657 = vmatprep.subr.bf16.mxu1 %v920_v0  ;;  %648 = vmatprep.mubr.msk.f32.mxu1 %vm921_vm0, %v922_v1  ;;  %v356_v8 = vld [vmem:[#allocation7 + $0x8] sm:$0xff]  ;;  %v357_v9 = vld [vmem:[#allocation7 + $0x10] sm:$0xff]  ;;  %v358_v10 = vld [vmem:[#allocation7 + $0x18] sm:$0xff]  ;;  %v655_v11 = vpack.c.bf16 %v273_v6, %v272_v4  ;;  %s268_s28 = scalar_lea.vmem [#allocation8], %s572_s13  ;;  %vm459_vm2 = vcmask 130048   ;;  %s1152_s15 = scalar_lea.hbm %s1201_s5, %s580_s11 }
  0x6c   : > { %653 = vmatpush3.bf16.msra.mxu0 %v652_v5  ;;  %v658_v12 = vpack.c.bf16 %v356_v8, %v355_v7  ;;  %v661_v13 = vpack.c.bf16 %v358_v10, %v357_v9  ;;  %v359_v14 = vld [vmem:[#allocation7 + $0x20] sm:$0xff]  ;;  %v360_v15 = vld [vmem:[#allocation7 + $0x28] sm:$0xff]  ;;  %v269_v16 = vld [vmem:[%s1129_s17] sm:$0xff]  ;;  %s475_s7 = sshll.u32 %s268_s28, 4  ;;  %s462_s16 = scalar_lea.sflag [#allocation4], %s1123_s12  ;;  %s1154_s7 = int_to_ptr.vmem [resolvable:$true] %s475_s7 }
  0x6d   : > { %654 = vmatprep.subr.bf16.mxu0 %v920_v0  ;;  %v664_v17 = vpack.c.bf16 %v360_v15, %v359_v14  ;;  %v361_v18 = vld [vmem:[#allocation7 + $0x30] sm:$0xff]  ;;  %v362_v19 = vld [vmem:[#allocation7 + $0x38] sm:$0xff]  ;;  %v363_v21 = vld [vmem:[#allocation7 + $0x40] sm:$0xff]  ;;  %s843_s9 = scalar_lea.vmem %s1154_s7, 128  ;;  %p1215_p0 = scmp.ne.s32.totalorder %s1210_s23, 0 }
  0x6e   : > { %659 = vmatpush3.bf16.msra.mxu1 %v658_v12  ;;  %v667_v20 = vpack.c.bf16 %v362_v19, %v361_v18  ;;  %v364_v22 = vld [vmem:[#allocation7 + $0x48] sm:$0xff]  ;;  %v365_v24 = vld [vmem:[#allocation7 + $0x50] sm:$0xff]  ;;  %v366_v25 = vld [vmem:[#allocation7 + $0x58] sm:$0xff]  ;;  %p844_p11 = scmp.ne.s32.totalorder %s1154_s7, %s843_s9  ;;  %s923_s22 = smov [#allocation8]  }
  0x6f   : > { %660 = vmatprep.subr.bf16.mxu1 %v920_v0  ;;  %v670_v23 = vpack.c.bf16 %v364_v22, %v363_v21  ;;  %v673_v26 = vpack.c.bf16 %v366_v25, %v365_v24  ;;  %v367_v27 = vld [vmem:[#allocation7 + $0x60] sm:$0xff]  ;;  %v368_v28 = vld [vmem:[#allocation7 + $0x68] sm:$0xff]  ;;  %v369_v30 = vld [vmem:[#allocation7 + $0x70] sm:$0xff]  ;;  %s847_s13 = sshll.u32 %s923_s22, 4  ;;  %s848_s13 = int_to_ptr.vmem [resolvable:$false] %s847_s13 }
  0x70   : > { %656 = vmatpush3.bf16.msra.mxu0 %v655_v11  ;;  %v676_v29 = vpack.c.bf16 %v368_v28, %v367_v27  ;;  %v370_v31 = vld [vmem:[#allocation7 + $0x78] sm:$0xff]  ;;  %v576_v33 = vld [vmem:[%s1198_s2] ss:$0 sm:$0xff]  ;;  %p845_p1 = pnand %p844_p11, %p1215_p0  ;;  %s849_s29 = scalar_lea.vmem %s848_s13, 256 }
  0x71   : > { %v679_v32 = vpack.c.bf16 %v370_v31, %v369_v30  ;;  %v578_v37 = vld [vmem:[%s1200_s4] ss:$0 sm:$0xff]  ;;  %p850_p7 = scmp.lt.s32.totalorder %s1154_s7, %s848_s13  ;;  %p851_p9 = scmp.lt.s32.totalorder %s849_s29, %s843_s9 }
  0x72   : > { %662 = vmatpush3.bf16.msra.mxu1 %v661_v13  ;;  %p846_p3 = pneg %p845_p1 }
  0x73   : > { %614 = vmatmul.mubr.msk.f32.vlgmr.msra.gmra.mrb[0].mxu0 %vm281_vm1, %v269_v16  ;;  %663 = vmatprep.subr.bf16.mxu1 %v920_v0  ;;  %p852_p12 = por %p851_p9, %p850_p7 }
  0x75   : > { %p853_p2 = pnand %p852_p12, %p846_p3 }
  0x76   : > { %665 = vmatpush3.bf16.msra.mxu1 %v664_v17 }
  0x77   : > { %666 = vmatprep.subr.bf16.mxu1 %v920_v0 }
  0x7a   : > { %668 = vmatpush3.bf16.msra.mxu1 %v667_v20 }
  0x7b   : > { %669 = vmatprep.subr.bf16.mxu1 %v920_v0 }
  0x7e   : > { %671 = vmatpush3.bf16.msra.mxu1 %v670_v23 }
  0x7f   : > { %672 = vmatprep.subr.bf16.mxu1 %v920_v0 }
  0x82   : > { %674 = vmatpush3.bf16.msra.mxu1 %v673_v26 }
  0x83   : > { %675 = vmatprep.subr.bf16.mxu1 %v920_v0 }
  0x86   : > { %677 = vmatpush3.bf16.msra.mxu1 %v676_v29 }
  0x87   : > { %678 = vmatprep.subr.bf16.mxu1 %v920_v0 }
  0x8a   : > { %680 = vmatpush3.bf16.msra.mxu1 %v679_v32 }
 0x146   : > { %v351_v34 = vpop.f32.mrb[0].mxu0 }
 0x147   : > { %v352_v35 = vadd.f32 %v576_v33, %v351_v34  ;;  %v615_v36 = vpop.f32.mrb[1].mxu0 }
 0x149   : > { %649 = vmatmul.mubr.f32.vlgmr.msra.gmra.mrb[0].mxu1 %v352_v35 }
 0x21c   : > { %v444_v38 = vpop.f32.mrb[0].mxu1 }
 0x21d   : > { %v445_v39 = vadd.f32 %v578_v37, %v444_v38  ;;  %v650_v40 = vpop.f32.mrb[1].mxu1 }
 0x21f   : > { %448 = vmax.xlane.f32.xlu0 %v445_v39 }
 0x2ac   : > { %v449_v41 = vpop.xlane.xlu0 %448 }
 0x2ad   : > { %v450_v42 = vsub.f32 %v445_v39, %v449_v41 }
 0x2af   : > { %v451_v43 = vmul.f32 1.442695, %v450_v42 }
 0x2b1   : > { %753 = vpow2.f32 %v451_v43 }
 0x2bb   : > { %v754_v44 = vpop.eup %753 }
 0x2bc   : > { %453 = vadd.xlane.f32.xlu0 %v754_v44 }
 0x349   : > { %v454_v45 = vpop.xlane.xlu0 %453 }
 0x34a   : > { %755 = vlog2.f32 %v454_v45 }
 0x354   : > { %v756_v46 = vpop.eup %755 }
 0x355   : > { %v456_v47 = vmul.f32 0.6931472, %v756_v46 }
 0x357   : > { %v457_v48 = vadd.f32 %v456_v47, %v449_v41 }
 0x359   : > { %v458_v49 = vsub.f32 %v445_v39, %v457_v48 }
 0x35b   : > { %460 = vst.msk [vmem:[%s268_s28] sm:$0xff] %vm459_vm2, %v458_v49 }
 0x35c   : > { %856 = shalt.err (!%p853_p2)
}
 0x35d   : > { %s857_s12 = scalar_lea.hbm %s1152_s15, 128  ;;  %s861_s26 = scalar_lea.hbm %s1201_s5, 256 }
 0x35e   : > { %p858_p13 = scmp.ne.s32.totalorder %s1152_s15, %s857_s12  ;;  %p862_p4 = scmp.lt.u32.totalorder %s1152_s15, %s1201_s5 }
 0x35f   : > { %p863_p5 = scmp.lt.u32.totalorder %s861_s26, %s857_s12  ;;  %p865_p11 = scmp.lt.u32.totalorder %s857_s12, %s1152_s15 }
 0x360   : > { %p859_p6 = pnand %p858_p13, %p1215_p0 }
 0x361   : > { %p864_p8 = por %p863_p5, %p862_p4 }
 0x362   : > { %p860_p10 = pneg %p859_p6 }
 0x363   : > { %p866_p1 = por %p865_p11, %p864_p8 }
 0x365   : > { %p867_p3 = pnand %p866_p1, %p860_p10 }
 0x367   : > { %870 = shalt.err (!%p867_p3)
}
 0x368   : > { %691 = dma.vmem_to_hbm [thread:$0]  (%p1215_p0), %s1154_s7, 128, %s1152_s15, %s462_s16  }
 0x369 PF: > { %s487_s11 = sand.u32 1, %s901_s18   ;;  %p1216_p7 = scmp.ne.s32.totalorder %s1206_s25, 0 }
 0x36a   : > { %p1217_p9 = scmp.ge.s32.totalorder %s913_s21, 2  ;;  %s488_s28 = scalar_lea.sflag [#allocation4], %s487_s11 }
 0x36c   : > { %p705_p12 = pnand %p1217_p9, %p1216_p7 }
 0x36e   : > { %896 = dma.done.wait (!%p705_p12), %s488_s28, 128  }
 0x36f   : > { %898 = vsyncadd (!%p705_p12), %s488_s28, 4294967168  ;;  %p19_p2 = scmp.ge.s32.totalorder %s1064_s14, 4   ;;  %s1218_s18 = smov %s905_s19 }
 0x370   : > { %s1219_s19 = smov %s909_s20  ;;  %s1220_s20 = smov %s1080_s27 }
 0x371   : > { %s1221_s21 = smov %s1064_s14  ;;  %21 = sbr.rel (!%p19_p2) target bundleno = 6 (0x6), region = 93 }
 0x378   :  { %493 = vsyncpa [#allocation3], 1 }
 0x379   :  { %495 = vsyncpa [#allocation3 + $0x1], 1 }
 0x37a   :  { %496 = vsyncpa [#allocation6], 1 }
 0x37b   :  { %497 = vsyncpa [#allocation4], 1 }
 0x37c   :  { %499 = vsyncpa [#allocation4 + $0x1], 1 }

</bundles_post_ra>
